<compile_context>
chip_gen: v5e
topology: v5e:2x2
jax: 0.10.0
libtpu: 0.0.40
codegen_flags: <defaults>
</compile_context>

<pallas_src>
import functools

import jax
import jax.numpy as jnp
from jax.experimental import pallas as pl
from jax.experimental.pallas import tpu as pltpu

LANE = 128      # vreg lane width
SUBLANE = 8     # f32 sublane count


def _round_up(n: int, m: int) -> int:
    return ((n + m - 1) // m) * m


def discriminator_kernel(x_ref, w1_ref, b1_ref, w2_ref, b2_ref, w3_ref, b3_ref,
                         o_ref, *, compute_dtype):
    """One batch tile of the full 3-layer MLP forward, entirely in VMEM.

    Weights arrive already cast to `compute_dtype` (hoisted to prepare time);
    only the activations are cast right before each MXU dot.  Accumulation is
    always f32 and all elementwise math is f32.
    """
    x = x_ref[...].astype(compute_dtype)

    h1 = jnp.dot(x, w1_ref[...], preferred_element_type=jnp.float32) + b1_ref[...]
    h1 = jnp.maximum(h1, 0.0)                                   # ReLU (f32)

    h2 = jnp.dot(h1.astype(compute_dtype), w2_ref[...],
                 preferred_element_type=jnp.float32) + b2_ref[...]
    h2 = jnp.maximum(h2, 0.0)                                   # ReLU (f32)

    h3 = jnp.dot(h2.astype(compute_dtype), w3_ref[...],
                 preferred_element_type=jnp.float32) + b3_ref[...]

    # sigmoid(h3): exp on the EUP; reciprocal exact in f32 mode, EUP vrcp in
    # the low-precision mode (costless alongside the exp).
    approx = jnp.dtype(compute_dtype) != jnp.dtype(jnp.float32)
    sig = pl.reciprocal(1.0 + jnp.exp(-h3), approx=approx)
    o_ref[...] = sig.astype(o_ref.dtype)


def prepare_params(params, *, compute_dtype=jnp.float32):
    """One-time padding / casting of the six parameters (static across calls).

    Hidden dims are zero-padded to a multiple of 128 lanes (zero weight
    rows/cols + zero bias + relu(0)=0 is semantics-preserving); the input
    contraction dim and the output dim stay unpadded so the per-call HBM I/O
    carries no padding.  Weights are cast to `compute_dtype` once here.
    """
    w1, b1, w2, b2, w3, b3 = (params[k] for k in ("w1", "b1", "w2", "b2", "w3", "b3"))
    in_size, hidden = w1.shape
    out_size = w3.shape[1]
    hid_p = _round_up(hidden, LANE)

    def pad2(a, rows, cols, dtype):
        a = jnp.asarray(a, dtype)
        return jnp.pad(a, ((0, rows - a.shape[0]), (0, cols - a.shape[1])))

    return dict(
        w1=pad2(w1, in_size, hid_p, compute_dtype),   # (in_size, hid_p)
        b1=pad2(b1, 1, hid_p, jnp.float32),
        w2=pad2(w2, hid_p, hid_p, compute_dtype),     # (hid_p, hid_p)
        b2=pad2(b2, 1, hid_p, jnp.float32),
        w3=pad2(w3, hid_p, out_size, compute_dtype),  # (hid_p, out_size)
        b3=pad2(b3, 1, out_size, jnp.float32),
        compute_dtype=compute_dtype,
    )


def discriminator_forward(x, prepared, *, max_tile_b=2048):
    """x: (B, input_size) float32.  prepared: output of prepare_params."""
    w1, b1, w2, b2, w3, b3 = (prepared[k] for k in ("w1", "b1", "w2", "b2", "w3", "b3"))
    compute_dtype = prepared["compute_dtype"]

    B, in_size = x.shape
    assert in_size == w1.shape[0], "input feature dim mismatch"
    hid_p = w1.shape[1]
    out_size = w3.shape[1]

    # ---- batch tiling ------------------------------------------------------
    b_pad8 = _round_up(max(B, SUBLANE), SUBLANE)
    if b_pad8 < 2 * LANE:
        # Tiny batch: one grid step, block = full array dims.
        tile_b = b_pad8
    else:
        # Lane-aligned tile and >= 2 grid steps so both v7x TCs get work.
        lane_groups = pl.cdiv(b_pad8, LANE)
        tile_lanes = min(max(1, max_tile_b // LANE), max(1, lane_groups // 2))
        tile_b = tile_lanes * LANE
    b_pad = _round_up(b_pad8, tile_b)
    grid = (b_pad // tile_b,)

    # Only pad the batch dim, and only when actually ragged.
    x_in = x if b_pad == B else jnp.pad(x, ((0, b_pad - B), (0, 0)))

    # Weights / biases are tiny (<130 KiB padded): whole-array VMEM residents.
    resident = pl.BlockSpec(memory_space=pltpu.MemorySpace.VMEM)

    # VMEM budget from actual tile sizes (double-buffered I/O tiles, resident
    # weights, f32 activation slabs) with headroom; clamp to v7x's 64 MiB.
    w_itemsize = jnp.dtype(compute_dtype).itemsize
    w_bytes = (w1.size + w2.size + w3.size) * w_itemsize \
        + (b1.size + b2.size + b3.size) * 4
    io_bytes = 2 * tile_b * (in_size + out_size) * 4
    act_bytes = 4 * tile_b * hid_p * 4
    vmem_limit = int(min(64 << 20,
                         max(16 << 20, w_bytes + io_bytes + act_bytes + (4 << 20))))

    out = pl.pallas_call(
        functools.partial(discriminator_kernel, compute_dtype=compute_dtype),
        out_shape=jax.ShapeDtypeStruct((b_pad, out_size), jnp.float32),
        grid_spec=pltpu.PrefetchScalarGridSpec(
            num_scalar_prefetch=0,
            grid=grid,
            in_specs=[
                pl.BlockSpec((tile_b, in_size), lambda i: (i, 0)),  # x tile (unpadded feats)
                resident,                                           # W1  (in, hid_p)
                resident,                                           # b1
                resident,                                           # W2  (hid_p, hid_p)
                resident,                                           # b2
                resident,                                           # W3  (hid_p, out)
                resident,                                           # b3
            ],
            out_specs=pl.BlockSpec((tile_b, out_size), lambda i: (i, 0)),
        ),
        compiler_params=pltpu.CompilerParams(
            dimension_semantics=("parallel",),
            vmem_limit_bytes=vmem_limit,
        ),
    )(x_in, w1, b1, w2, b2, w3, b3)

    return out if b_pad == B else out[:B]


def init_params(key, input_size, hidden_size, output_size):
    """Deterministic synthetic init mirroring nn.Linear shapes.

    PyTorch stores Linear weight as (out, in); we keep the transposed
    (in, out) form so the kernel computes x @ W + b directly.
    """
    ks = jax.random.split(key, 6)

    def lin(kw, kb, fan_in, fan_out):
        bound = 1.0 / jnp.sqrt(fan_in)
        w = jax.random.uniform(kw, (fan_in, fan_out), jnp.float32, -bound, bound)
        b = jax.random.uniform(kb, (1, fan_out), jnp.float32, -bound, bound)
        return w, b

    w1, b1 = lin(ks[0], ks[1], input_size, hidden_size)
    w2, b2 = lin(ks[2], ks[3], hidden_size, hidden_size)
    w3, b3 = lin(ks[4], ks[5], hidden_size, output_size)
    return dict(w1=w1, b1=b1, w2=w2, b2=b2, w3=w3, b3=b3)


def reference_forward(x, p):
    h1 = jnp.maximum(x @ p["w1"] + p["b1"], 0.0)
    h2 = jnp.maximum(h1 @ p["w2"] + p["b2"], 0.0)
    return jax.nn.sigmoid(h2 @ p["w3"] + p["b3"])


if __name__ == "__main__":
    key = jax.random.PRNGKey(0)
    k_x, k_p = jax.random.split(key)

    batch, input_size, hidden_size, output_size = 16, 16, 32, 1
    x = jax.random.normal(k_x, (batch, input_size), jnp.float32)
    params = init_params(k_p, input_size, hidden_size, output_size)
    ref = reference_forward(x, params)

    # f32 path: PyTorch-exact semantics.
    prepared_f32 = prepare_params(params, compute_dtype=jnp.float32)
    out = jax.block_until_ready(discriminator_forward(x, prepared_f32))
    assert out.shape == (batch, output_size)
    assert jnp.allclose(out, ref, atol=1e-5, rtol=1e-5)

    # bf16 MXU-operand path (full-rate MXU on v5e/v6e/v7x, f32 accumulation,
    # f32 elementwise): looser tolerance as noted in the review.
    prepared_bf16 = prepare_params(params, compute_dtype=jnp.bfloat16)
    out_bf16 = jax.block_until_ready(discriminator_forward(x, prepared_bf16))
    assert out_bf16.shape == (batch, output_size)
    assert jnp.allclose(out_bf16, ref, atol=5e-2)

    print("KERNEL_OK")
</pallas_src>

<mosaic_0001>
module attributes {stable_mosaic.version = 11 : i64} {
  func.func @discriminator_kernel(%arg0: i32, %arg1: memref<16x16xf32, #tpu.memory_space<vmem>>, %arg2: memref<16x128xf32, #tpu.memory_space<vmem>>, %arg3: memref<1x128xf32, #tpu.memory_space<vmem>>, %arg4: memref<128x128xf32, #tpu.memory_space<vmem>>, %arg5: memref<1x128xf32, #tpu.memory_space<vmem>>, %arg6: memref<128x1xf32, #tpu.memory_space<vmem>>, %arg7: memref<1x1xf32, #tpu.memory_space<vmem>>, %arg8: memref<16x1xf32, #tpu.memory_space<vmem>>) attributes {dimension_semantics = [#tpu.dimension_semantics<parallel>], iteration_bounds = array<i64: 1>, scalar_prefetch = 0 : i64, scratch_operands = 0 : i64, tpu.core_type = #tpu.core_type<tc>, window_params = [{transform_indices = @transform_0, window_bounds = array<i64: 16, 16>}, {pipeline_mode = #tpu.pipeline_mode<synchronous>, transform_indices = @transform_1, window_bounds = array<i64: 16, 128>}, {pipeline_mode = #tpu.pipeline_mode<synchronous>, transform_indices = @transform_2, window_bounds = array<i64: 1, 128>}, {pipeline_mode = #tpu.pipeline_mode<synchronous>, transform_indices = @transform_3, window_bounds = array<i64: 128, 128>}, {pipeline_mode = #tpu.pipeline_mode<synchronous>, transform_indices = @transform_4, window_bounds = array<i64: 1, 128>}, {pipeline_mode = #tpu.pipeline_mode<synchronous>, transform_indices = @transform_5, window_bounds = array<i64: 128, 1>}, {pipeline_mode = #tpu.pipeline_mode<synchronous>, transform_indices = @transform_6, window_bounds = array<i64: 1, 1>}, {transform_indices = @transform_7, window_bounds = array<i64: 16, 1>}]} {
    %c0 = arith.constant 0 : index
    %c0_0 = arith.constant 0 : index
    %0 = vector.load %arg1[%c0, %c0_0] : memref<16x16xf32, #tpu.memory_space<vmem>>, vector<16x16xf32>
    %c0_1 = arith.constant 0 : index
    %c0_2 = arith.constant 0 : index
    %1 = vector.load %arg2[%c0_1, %c0_2] : memref<16x128xf32, #tpu.memory_space<vmem>>, vector<16x128xf32>
    %cst = arith.constant dense<0.000000e+00> : vector<16x128xf32>
    %2 = tpu.matmul %0, %1, %cst {dimension_numbers = #tpu.dot_dimension_numbers<[1], [0], [0], [1], [0, 0, 1, 1], [], []>} : vector<16x16xf32>, vector<16x128xf32>, vector<16x128xf32> -> vector<16x128xf32>
    %c0_3 = arith.constant 0 : index
    %c0_4 = arith.constant 0 : index
    %3 = vector.load %arg3[%c0_3, %c0_4] : memref<1x128xf32, #tpu.memory_space<vmem>>, vector<1x128xf32>
    %4 = vector.broadcast %3 : vector<1x128xf32> to vector<16x128xf32>
    %5 = arith.addf %2, %4 : vector<16x128xf32>
    %cst_5 = arith.constant 0.000000e+00 : f32
    %6 = vector.broadcast %cst_5 : f32 to vector<16x128xf32>
    %7 = arith.maximumf %5, %6 : vector<16x128xf32>
    %c0_6 = arith.constant 0 : index
    %c0_7 = arith.constant 0 : index
    %8 = vector.load %arg4[%c0_6, %c0_7] : memref<128x128xf32, #tpu.memory_space<vmem>>, vector<128x128xf32>
    %cst_8 = arith.constant dense<0.000000e+00> : vector<16x128xf32>
    %9 = tpu.matmul %7, %8, %cst_8 {dimension_numbers = #tpu.dot_dimension_numbers<[1], [0], [0], [1], [0, 0, 1, 1], [], []>} : vector<16x128xf32>, vector<128x128xf32>, vector<16x128xf32> -> vector<16x128xf32>
    %c0_9 = arith.constant 0 : index
    %c0_10 = arith.constant 0 : index
    %10 = vector.load %arg5[%c0_9, %c0_10] : memref<1x128xf32, #tpu.memory_space<vmem>>, vector<1x128xf32>
    %11 = vector.broadcast %10 : vector<1x128xf32> to vector<16x128xf32>
    %12 = arith.addf %9, %11 : vector<16x128xf32>
    %cst_11 = arith.constant 0.000000e+00 : f32
    %13 = vector.broadcast %cst_11 : f32 to vector<16x128xf32>
    %14 = arith.maximumf %12, %13 : vector<16x128xf32>
    %c0_12 = arith.constant 0 : index
    %c0_13 = arith.constant 0 : index
    %15 = vector.load %arg6[%c0_12, %c0_13] : memref<128x1xf32, #tpu.memory_space<vmem>>, vector<128x1xf32>
    %cst_14 = arith.constant dense<0.000000e+00> : vector<16x1xf32>
    %16 = tpu.matmul %14, %15, %cst_14 {dimension_numbers = #tpu.dot_dimension_numbers<[1], [0], [0], [1], [0, 0, 1, 1], [], []>} : vector<16x128xf32>, vector<128x1xf32>, vector<16x1xf32> -> vector<16x1xf32>
    %c0_15 = arith.constant 0 : index
    %c0_16 = arith.constant 0 : index
    %17 = vector.load %arg7[%c0_15, %c0_16] : memref<1x1xf32, #tpu.memory_space<vmem>>, vector<1x1xf32>
    %18 = vector.broadcast %17 : vector<1x1xf32> to vector<16x1xf32>
    %19 = arith.addf %16, %18 : vector<16x1xf32>
    %cst_17 = arith.constant 0.000000e+00 : f32
    %20 = vector.broadcast %cst_17 : f32 to vector<16x1xf32>
    %21 = arith.subf %20, %19 : vector<16x1xf32>
    %22 = math.exp %21 : vector<16x1xf32>
    %cst_18 = arith.constant 1.000000e+00 : f32
    %23 = vector.broadcast %cst_18 : f32 to vector<16x1xf32>
    %24 = arith.addf %23, %22 : vector<16x1xf32>
    %25 = tpu.reciprocal %24 : vector<16x1xf32> -> vector<16x1xf32>
    %c0_19 = arith.constant 0 : index
    %c0_20 = arith.constant 0 : index
    %26 = vector.load %arg8[%c0_19, %c0_20] : memref<16x1xf32, #tpu.memory_space<vmem>>, vector<16x1xf32>
    tpu.vector_store %arg8[%c0_19, %c0_20], %25 {strides = array<i32>} : memref<16x1xf32, #tpu.memory_space<vmem>>, vector<16x1xf32>,
    return
  }
  func.func @transform_0(%arg0: i32) -> (i32, i32) {
    %c0_i32 = arith.constant 0 : i32
    %c0_i32_0 = arith.constant 0 : i32
    return %arg0, %c0_i32 : i32, i32
  }
  func.func @transform_1(%arg0: i32) -> (i32, i32) {
    %c0_i32 = arith.constant 0 : i32
    %c0_i32_0 = arith.constant 0 : i32
    %c0_i32_1 = arith.constant 0 : i32
    return %c0_i32, %c0_i32_0 : i32, i32
  }
  func.func @transform_2(%arg0: i32) -> (i32, i32) {
    %c0_i32 = arith.constant 0 : i32
    %c0_i32_0 = arith.constant 0 : i32
    %c0_i32_1 = arith.constant 0 : i32
    return %c0_i32, %c0_i32_0 : i32, i32
  }
  func.func @transform_3(%arg0: i32) -> (i32, i32) {
    %c0_i32 = arith.constant 0 : i32
    %c0_i32_0 = arith.constant 0 : i32
    %c0_i32_1 = arith.constant 0 : i32
    return %c0_i32, %c0_i32_0 : i32, i32
  }
  func.func @transform_4(%arg0: i32) -> (i32, i32) {
    %c0_i32 = arith.constant 0 : i32
    %c0_i32_0 = arith.constant 0 : i32
    %c0_i32_1 = arith.constant 0 : i32
    return %c0_i32, %c0_i32_0 : i32, i32
  }
  func.func @transform_5(%arg0: i32) -> (i32, i32) {
    %c0_i32 = arith.constant 0 : i32
    %c0_i32_0 = arith.constant 0 : i32
    %c0_i32_1 = arith.constant 0 : i32
    return %c0_i32, %c0_i32_0 : i32, i32
  }
  func.func @transform_6(%arg0: i32) -> (i32, i32) {
    %c0_i32 = arith.constant 0 : i32
    %c0_i32_0 = arith.constant 0 : i32
    %c0_i32_1 = arith.constant 0 : i32
    return %c0_i32, %c0_i32_0 : i32, i32
  }
  func.func @transform_7(%arg0: i32) -> (i32, i32) {
    %c0_i32 = arith.constant 0 : i32
    %c0_i32_0 = arith.constant 0 : i32
    return %arg0, %c0_i32 : i32, i32
  }
}

</mosaic_0001>

<bundles_post_ra>
// kernel: tpu_custom_call.1
= control target key start
LH: loop header
LB: loop body
LE: loop exit
PB: predicated region body
PF: predicated region fallthrough
CT: control target
= control target key end

     0   :  { %s499_s0 = inlined_call_operand.hbm [shape: f32[16,16], index: 0, kind: input, shape index: {}]   ;;  %s500_s1 = inlined_call_operand.hbm [shape: f32[16,128], index: 1, kind: input, shape index: {}]   ;;  %s501_s2 = inlined_call_operand.vmem [shape: f32[1,128], index: 2, kind: input, shape index: {}]   ;;  %s502_s3 = inlined_call_operand.vmem [shape: f32[128,128], index: 3, kind: input, shape index: {}]   ;;  %s503_s4 = inlined_call_operand.vmem [shape: f32[1,128], index: 4, kind: input, shape index: {}]   ;;  %s504_s5 = inlined_call_operand.vmem [shape: f32[128,1], index: 5, kind: input, shape index: {}]   ;;  %s505_s6 = inlined_call_operand.<no memory space> [shape: f32[1,1], index: 6, kind: input, shape index: {}]   ;;  %s506_s7 = inlined_call_operand.vmem [shape: f32[16,1], index: 7, kind: output, shape index: {}]  }
   0x1   :  { %v12_v0 = vstv %s505_s6 }
   0x2   :  { %13 = vst [vmem:[#allocation2] sm:$0x1] %v12_v0 }
   0x3   :  { %14 = vsyncpa [#allocation4], 0  ;;  %s20_s28 = sshll.u32 %s499_s0, 4  ;;  %s21_s28 = int_to_ptr.hbm [resolvable:$true] %s20_s28 }
   0x4   :  { %15 = vsyncpa [#allocation6], 0  ;;  %s334_s29 = smov [#allocation3]   ;;  %s33_s10 = sshll.u32 %s500_s1, 4  ;;  %s34_s10 = int_to_ptr.hbm [resolvable:$true] %s33_s10 }
   0x5   :  { %s22_s30 = sshll.u32 %s334_s29, 4  ;;  %s335_s11 = smov 128   ;;  %s23_s30 = int_to_ptr.vmem [resolvable:$true] %s22_s30 }
   0x6   :  { %s336_s12 = smov 8   ;;  %s337_s6 = smov [#allocation5]  }
   0x7   :  { %28 = dma.hbm_to_vmem [thread:$0]  %s21_s28, 256, %s23_s30, [#allocation4], %s335_s11, %s335_s11, %s336_s12  }
   0x8   :  { %s35_s13 = sshll.u32 %s337_s6, 4  ;;  %s36_s13 = int_to_ptr.vmem [resolvable:$true] %s35_s13 }
   0x9   :  { %41 = dma.hbm_to_vmem [thread:$0]  %s34_s10, 256, %s36_s13, [#allocation6], %s335_s11, %s335_s11, %s336_s12  }
   0xa   :  { %330 = dma.done.wait [#allocation4], 256  }
   0xb   :  { %331 = vsyncadd [#allocation4], 4294967040 }
   0xc   :  { %332 = dma.done.wait [#allocation6], 256  }
   0xd   :  { %333 = vsyncadd [#allocation6], 4294967040  ;;  %v63_v1 = vld [vmem:[#allocation5 + $0x8] sm:$0xff]  ;;  %v62_v2 = vld [vmem:[#allocation5] sm:$0xff]  ;;  %vm68_vm0 = vcmask 130048   ;;  %vm224_vm4 = vcmask 7168  }
   0xe   :  { %89 = vmatpush.msra.mxu0 %v63_v1  ;;  %v60_v3 = vld [vmem:[#allocation3] sm:$0xff]  ;;  %v115_v4 = vld [vmem:[%s502_s3 + $0x78] sm:$0xff]  ;;  %v114_v5 = vld [vmem:[%s502_s3 + $0x70] sm:$0xff] }
   0xf   :  { %120 = vmatpush.msra.mxu1 %v115_v4  ;;  %235 = vmatpush.msra.mxu3 %v115_v4  ;;  %v113_v6 = vld [vmem:[%s502_s3 + $0x68] sm:$0xff]  ;;  %v112_v7 = vld [vmem:[%s502_s3 + $0x60] sm:$0xff]  ;;  %v111_v8 = vld [vmem:[%s502_s3 + $0x58] sm:$0xff] }
  0x10   :  { %90 = vmatpush.msra.mxu0 %v62_v2  ;;  %v61_v9 = vld [vmem:[#allocation3 + $0x8] sm:$0xff]  ;;  %v108_v12 = vld [vmem:[%s502_s3 + $0x40] sm:$0xff]  ;;  %v107_v13 = vld [vmem:[%s502_s3 + $0x38] sm:$0xff] }
  0x11   :  { %233 = vmatmul.msk.f32.vlgmr.msra.gmra.mxu0 %vm68_vm0, %v60_v3  ;;  %121 = vmatpush.msra.mxu1 %v114_v5  ;;  %v110_v10 = vld [vmem:[%s502_s3 + $0x50] sm:$0xff]  ;;  %v109_v11 = vld [vmem:[%s502_s3 + $0x48] sm:$0xff]  ;;  %v104_v16 = vld [vmem:[%s502_s3 + $0x20] sm:$0xff] }
  0x12   :  { %236 = vmatpush.msra.mxu3 %v114_v5  ;;  %v106_v14 = vld [vmem:[%s502_s3 + $0x30] sm:$0xff]  ;;  %v105_v15 = vld [vmem:[%s502_s3 + $0x28] sm:$0xff]  ;;  %v103_v17 = vld [vmem:[%s502_s3 + $0x18] sm:$0xff] }
  0x13   :  { %122 = vmatpush.msra.mxu1 %v113_v6  ;;  %v102_v18 = vld [vmem:[%s502_s3 + $0x10] sm:$0xff]  ;;  %v101_v19 = vld [vmem:[%s502_s3 + $0x8] sm:$0xff]  ;;  %v100_v20 = vld [vmem:[%s502_s3] sm:$0xff] }
  0x14   :  { %237 = vmatpush.msra.mxu3 %v113_v6  ;;  %v160_v21 = vld [vmem:[%s504_s5 + $0x78] sm:$0xff]  ;;  %v159_v22 = vld [vmem:[%s504_s5 + $0x70] sm:$0xff]  ;;  %v158_v23 = vld [vmem:[%s504_s5 + $0x68] sm:$0xff] }
  0x15   :  { %123 = vmatpush.msra.mxu1 %v112_v7  ;;  %165 = vmatpush.msrb.mxu0 %v160_v21  ;;  %v157_v24 = vld [vmem:[%s504_s5 + $0x60] sm:$0xff]  ;;  %v156_v25 = vld [vmem:[%s504_s5 + $0x58] sm:$0xff]  ;;  %v155_v26 = vld [vmem:[%s504_s5 + $0x50] sm:$0xff] }
  0x16   :  { %238 = vmatpush.msra.mxu3 %v112_v7  ;;  %251 = vmatpush.msra.mxu2 %v160_v21  ;;  %v154_v27 = vld [vmem:[%s504_s5 + $0x48] sm:$0xff]  ;;  %v153_v28 = vld [vmem:[%s504_s5 + $0x40] sm:$0xff]  ;;  %v152_v29 = vld [vmem:[%s504_s5 + $0x38] sm:$0xff] }
  0x17   :  { %124 = vmatpush.msra.mxu1 %v111_v8  ;;  %166 = vmatpush.msrb.mxu0 %v159_v22  ;;  %v271_v30 = vld [vmem:[%s501_s2] ss:$0 sm:$0xff]  ;;  %v151_v31 = vld [vmem:[%s504_s5 + $0x30] sm:$0xff]  ;;  %v150_v32 = vld [vmem:[%s504_s5 + $0x28] sm:$0xff] }
  0x18   :  { %239 = vmatpush.msra.mxu3 %v111_v8  ;;  %252 = vmatpush.msra.mxu2 %v159_v22  ;;  %v149_v35 = vld [vmem:[%s504_s5 + $0x20] sm:$0xff]  ;;  %v148_v37 = vld [vmem:[%s504_s5 + $0x18] sm:$0xff]  ;;  %v147_v41 = vld [vmem:[%s504_s5 + $0x10] sm:$0xff] }
  0x19   :  { %234 = vmatmul.msk.f32.gmra.mxu0 %vm68_vm0, %v61_v9  ;;  %125 = vmatpush.msra.mxu1 %v110_v10  ;;  %v146_v42 = vld [vmem:[%s504_s5 + $0x8] sm:$0xff]  ;;  %v145_v43 = vld [vmem:[%s504_s5] sm:$0xff] }
  0x1a   :  { %240 = vmatpush.msra.mxu3 %v110_v10  ;;  %167 = vmatpush.msrb.mxu0 %v158_v23  ;;  %v272_v44 = vld [vmem:[%s503_s4] ss:$0 sm:$0xff] }
  0x1b   :  { %126 = vmatpush.msra.mxu1 %v109_v11  ;;  %253 = vmatpush.msra.mxu2 %v158_v23  ;;  %v273_v51 = vld [vmem:[#allocation2] ss:$0 sm:$0xff] }
  0x1c   :  { %241 = vmatpush.msra.mxu3 %v109_v11  ;;  %168 = vmatpush.msrb.mxu0 %v157_v24 }
  0x1d   :  { %127 = vmatpush.msra.mxu1 %v108_v12  ;;  %254 = vmatpush.msra.mxu2 %v157_v24 }
  0x1e   :  { %242 = vmatpush.msra.mxu3 %v108_v12  ;;  %169 = vmatpush.msrb.mxu0 %v156_v25 }
  0x1f   :  { %128 = vmatpush.msra.mxu1 %v107_v13  ;;  %255 = vmatpush.msra.mxu2 %v156_v25 }
  0x20   :  { %243 = vmatpush.msra.mxu3 %v107_v13  ;;  %170 = vmatpush.msrb.mxu0 %v155_v26 }
  0x21   :  { %129 = vmatpush.msra.mxu1 %v106_v14  ;;  %256 = vmatpush.msra.mxu2 %v155_v26 }
  0x22   :  { %244 = vmatpush.msra.mxu3 %v106_v14  ;;  %171 = vmatpush.msrb.mxu0 %v154_v27 }
  0x23   :  { %130 = vmatpush.msra.mxu1 %v105_v15  ;;  %257 = vmatpush.msra.mxu2 %v154_v27 }
  0x24   :  { %245 = vmatpush.msra.mxu3 %v105_v15  ;;  %172 = vmatpush.msrb.mxu0 %v153_v28 }
  0x25   :  { %131 = vmatpush.msra.mxu1 %v104_v16  ;;  %258 = vmatpush.msra.mxu2 %v153_v28 }
  0x26   :  { %246 = vmatpush.msra.mxu3 %v104_v16  ;;  %173 = vmatpush.msrb.mxu0 %v152_v29 }
  0x27   :  { %132 = vmatpush.msra.mxu1 %v103_v17  ;;  %259 = vmatpush.msra.mxu2 %v152_v29 }
  0x28   :  { %247 = vmatpush.msra.mxu3 %v103_v17  ;;  %174 = vmatpush.msrb.mxu0 %v151_v31 }
  0x29   :  { %133 = vmatpush.msra.mxu1 %v102_v18  ;;  %260 = vmatpush.msra.mxu2 %v151_v31 }
  0x2a   :  { %248 = vmatpush.msra.mxu3 %v102_v18  ;;  %175 = vmatpush.msrb.mxu0 %v150_v32 }
  0x2b   :  { %134 = vmatpush.msra.mxu1 %v101_v19  ;;  %261 = vmatpush.msra.mxu2 %v150_v32 }
  0x2c   :  { %249 = vmatpush.msra.mxu3 %v101_v19  ;;  %176 = vmatpush.msrb.mxu0 %v149_v35 }
  0x2d   :  { %135 = vmatpush.msra.mxu1 %v100_v20  ;;  %262 = vmatpush.msra.mxu2 %v149_v35 }
  0x2e   :  { %250 = vmatpush.msra.mxu3 %v100_v20  ;;  %177 = vmatpush.msrb.mxu0 %v148_v37 }
  0x2f   :  { %263 = vmatpush.msra.mxu2 %v148_v37 }
  0x30   :  { %178 = vmatpush.msrb.mxu0 %v147_v41 }
  0x31   :  { %264 = vmatpush.msra.mxu2 %v147_v41 }
  0x32   :  { %179 = vmatpush.msrb.mxu0 %v146_v42 }
  0x33   :  { %265 = vmatpush.msra.mxu2 %v146_v42 }
  0x34   :  { %180 = vmatpush.msrb.mxu0 %v145_v43 }
  0x35   :  { %266 = vmatpush.msra.mxu2 %v145_v43 }
  0x8e   :  { %v92_v33 = vpop.f32.mrf.mxu0 }
  0x8f   :  { %v93_v34 = vadd.f32 %v271_v30, %v92_v33 }
  0x91   :  { %v98_v36 = vmax.f32 %v93_v34, 0.0 }
  0x93   :  { %136 = vmatmul.f32.vlgmr.msra.gmra.mxu1 %v98_v36 }
  0x96   :  { %v95_v38 = vpop.f32.mrf.mxu0 }
  0x97   :  { %v96_v39 = vadd.f32 %v271_v30, %v95_v38 }
  0x99   :  { %v99_v40 = vmax.f32 %v96_v39, 0.0 }
  0x9b   :  { %139 = vmatmul.f32.vlgmr.msra.gmra.mxu3 %v99_v40 }
 0x110   :  { %v137_v45 = vpop.f32.mrf.mxu1 }
 0x111   :  { %v138_v46 = vadd.f32 %v272_v44, %v137_v45 }
 0x113   :  { %v143_v47 = vmax.f32 %v138_v46, 0.0 }
 0x115   :  { %181 = vmatmul.f32.vlgmr.msrb.gmra.mxu0 %v143_v47 }
 0x11e   :  { %v140_v48 = vpop.f32.mrf.mxu3 }
 0x11f   :  { %v141_v49 = vadd.f32 %v272_v44, %v140_v48 }
 0x121   :  { %v144_v50 = vmax.f32 %v141_v49, 0.0 }
 0x123   :  { %184 = vmatmul.f32.vlgmr.msra.gmra.mxu2 %v144_v50 }
 0x192   :  { %v182_v52 = vpop.f32.mrf.mxu0 }
 0x193   :  { %v183_v53 = vadd.f32 %v273_v51, %v182_v52 }
 0x195   :  { %v188_v54 = vsub.f32 0.0, %v183_v53 }
 0x197   :  { %v190_v55 = vmul.f32 1.442695, %v188_v54 }
 0x199   :  { %274 = vpow2.f32 %v190_v55 }
 0x19f   :  { %v275_v56 = vpop.eup %274 }
 0x1a0   :  { %v194_v57 = vadd.f32 1.0, %v275_v56 }
 0x1a2   :  { %276 = vrcp.f32 %v194_v57  ;;  %v207_v1 = vand.u32 2147483648, %v194_v57  ;;  %v205_v3 = vand.u32 2147483647, %v194_v57  ;;  %vm201_vm2 = vweird.f32 %v194_v57 }
 0x1a4   :  { %v208_v5 = vor.u32 1.1754944e-38, %v207_v1  ;;  %vm206_vm5 = vcmp.eq.f32.partialorder %v205_v3, 8.507059e+37 }
 0x1a6   :  { %v185_v58 = vpop.f32.mrf.mxu2 }
 0x1a7   :  { %v186_v59 = vadd.f32 %v273_v51, %v185_v58 }
 0x1a8   :  { %v277_v60 = vpop.eup %276 }
 0x1a9   :  { %v197_v61 = vmul.f32 %v277_v60, %v194_v57  ;;  %v189_v62 = vsub.f32 0.0, %v186_v59  ;;  %vm202_vm1 = vweird.f32 %v277_v60 }
 0x1aa   :  { %vm203_vm3 = vmor %vm201_vm2, %vm202_vm1 }
 0x1ab   :  { %v198_v63 = vsub.f32 1.0, %v197_v61  ;;  %v192_v0 = vmul.f32 1.442695, %v189_v62 }
 0x1ad   :  { %v199_v2 = vmul.f32 %v277_v60, %v198_v63  ;;  %278 = vpow2.f32 %v192_v0 }
 0x1af   :  { %v200_v4 = vadd.f32 %v277_v60, %v199_v2 }
 0x1b1   :  { %v204_v6 = vsel %vm203_vm3, %v277_v60, %v200_v4 }
 0x1b2   :  { %v209_v7 = vsel %vm206_vm5, %v208_v5, %v204_v6 }
 0x1b3   :  { %v279_v8 = vpop.eup %278  ;;  %225 = vst.msk [vmem:[%s506_s7] sm:$0xff] %vm224_vm4, %v209_v7 }
 0x1b4   :  { %v195_v9 = vadd.f32 1.0, %v279_v8 }
 0x1b6   :  { %280 = vrcp.f32 %v195_v9  ;;  %v221_v13 = vand.u32 2147483648, %v195_v9  ;;  %v219_v15 = vand.u32 2147483647, %v195_v9  ;;  %vm215_vm7 = vweird.f32 %v195_v9 }
 0x1b8   :  { %v222_v17 = vor.u32 1.1754944e-38, %v221_v13  ;;  %vm220_vm9 = vcmp.eq.f32.partialorder %v219_v15, 8.507059e+37 }
 0x1bc   :  { %v281_v10 = vpop.eup %280 }
 0x1bd   :  { %v211_v11 = vmul.f32 %v281_v10, %v195_v9  ;;  %vm216_vm6 = vweird.f32 %v281_v10 }
 0x1be   :  { %vm217_vm8 = vmor %vm215_vm7, %vm216_vm6 }
 0x1bf   :  { %v212_v12 = vsub.f32 1.0, %v211_v11 }
 0x1c1   :  { %v213_v14 = vmul.f32 %v281_v10, %v212_v12 }
 0x1c3   :  { %v214_v16 = vadd.f32 %v281_v10, %v213_v14 }
 0x1c5   :  { %v218_v18 = vsel %vm217_vm8, %v281_v10, %v214_v16 }
 0x1c6   :  { %v223_v19 = vsel %vm220_vm9, %v222_v17, %v218_v18 }
 0x1c7   :  { %226 = vst.msk [vmem:[%s506_s7 + $0x8] sm:$0xff] %vm224_vm4, %v223_v19 }
 0x1c8   :  { %231 = vsyncpa [#allocation4], 1 }
 0x1c9   :  { %232 = vsyncpa [#allocation6], 1 }

</bundles_post_ra>
